<compile_context>
chip_gen: v6e
topology: v6e:2x2x1
jax: 0.10.0
libtpu: 0.0.40
codegen_flags: <defaults>
</compile_context>

<pallas_src>
import math

import jax
import jax.numpy as jnp
from jax.experimental import pallas as pl
from jax.experimental.pallas import tpu as pltpu


def _round_up(x, m):
    return ((x + m - 1) // m) * m


def _pad2d(x, rows, cols, dtype):
    """Cast + zero-pad a 2-D array into a (rows, cols) buffer (single pass)."""
    x = jnp.asarray(x)
    if x.shape == (rows, cols) and x.dtype == dtype:
        return x
    buf = jnp.zeros((rows, cols), dtype)
    return buf.at[: x.shape[0], : x.shape[1]].set(x.astype(dtype))


def sage_kernel(a_t_ref, feat_src_ref, feat_dst_ref, wn_ref, ws_ref, b_ref,
                out_ref, acc_ref, deg_ref):
    k = pl.program_id(1)

    @pl.when(k == 0)
    def _():
        acc_ref[...] = jnp.zeros_like(acc_ref)
        deg_ref[...] = jnp.zeros_like(deg_ref)

    a_t = a_t_ref[...]                                       # (TD, TS) bf16

    # Per-destination in-degree contribution of this source tile (XLU lane
    # reduce, free slot under the memory-bound A DMA).
    deg_ref[...] += jnp.sum(a_t.astype(jnp.float32), axis=1, keepdims=True)

    # fc_neigh on this source tile, then aggregate into the dst accumulator.
    srcdata = jnp.dot(feat_src_ref[...], wn_ref[...],
                      preferred_element_type=jnp.float32)    # (TS, F_out) f32
    acc_ref[...] += jnp.dot(a_t, srcdata.astype(jnp.bfloat16),
                            preferred_element_type=jnp.float32)

    @pl.when(k == pl.num_programs(1) - 1)
    def _():
        deg = deg_ref[...]
        # Zero-degree guard: isolated dst nodes get 0 neighbor contribution.
        inv_deg = jnp.where(deg > 0.0,
                            pl.reciprocal(deg, approx=True),
                            jnp.zeros_like(deg))
        dstdata = acc_ref[...] * inv_deg                     # (TD, F_out)

        # fc_self + bias, computed once per output tile (not per k step).
        selfdata = jnp.dot(feat_dst_ref[...], ws_ref[...],
                           preferred_element_type=jnp.float32) + b_ref[...]
        out_ref[...] = (selfdata + dstdata).astype(out_ref.dtype)


def sage_conv(A, feat, w_neigh, w_self, b_self, *, td_max=512, ts_max=1024):
    """GraphSAGE forward.

    A:        (N_src, N_dst) dense adjacency (0/1 or weighted)
    feat:     (N_src, F_in) node features
    w_neigh:  (F_out, F_in)  like nn.Linear(fc_neigh).weight (no bias)
    w_self:   (F_out, F_in)  like nn.Linear(fc_self).weight
    b_self:   (F_out,)       fc_self bias
    """
    n_src, n_dst = A.shape
    f_in = feat.shape[1]
    f_out = w_neigh.shape[0]

    # Tile sizes: dst rows multiple of 16 sublanes (bf16), src cols multiple
    # of 128 lanes (lane-dense A^T blocks); clamped for tiny inputs.
    td = min(td_max, _round_up(n_dst, 16))
    ts = min(ts_max, _round_up(n_src, 128))
    n_dst_p = _round_up(n_dst, td)
    n_src_p = _round_up(n_src, ts)
    f_in_p = _round_up(f_in, 128)
    f_out_p = _round_up(f_out, 128)

    cdt = jnp.bfloat16  # MXU operand dtype; accumulation stays f32

    A32 = jnp.asarray(A, jnp.float32)
    feat32 = jnp.asarray(feat, jnp.float32)

    # Pre-transpose A in the wrapper (fused with the pad copy); pad everything
    # to the tiled shapes. The feature matrix is padded ONCE and passed twice
    # (feat_src / feat_dst see it through different BlockSpecs).
    a_t = _pad2d(A32.T, n_dst_p, n_src_p, cdt)
    n_feat_p = max(n_src_p, n_dst_p)
    feat_p = _pad2d(feat32, n_feat_p, f_in_p, cdt)
    wn = _pad2d(jnp.asarray(w_neigh, jnp.float32).T, f_in_p, f_out_p, cdt)
    ws = _pad2d(jnp.asarray(w_self, jnp.float32).T, f_in_p, f_out_p, cdt)
    b = _pad2d(jnp.asarray(b_self, jnp.float32)[None, :], 1, f_out_p,
               jnp.float32)

    n_dst_tiles = n_dst_p // td
    n_src_tiles = n_src_p // ts
    grid = (n_dst_tiles, n_src_tiles)

    flops = int(2 * n_dst_p * n_src_p * f_out_p                 # aggregation
                + 2 * n_src_p * f_in_p * f_out_p * n_dst_tiles  # fc_neigh
                + 2 * n_dst_p * f_in_p * f_out_p)               # fc_self
    bytes_accessed = int(a_t.size * 2                           # A^T once
                         + n_src_p * f_in_p * 2 * n_dst_tiles   # feat_src
                         + n_dst_p * f_in_p * 2                 # feat_dst
                         + wn.size * 2 + ws.size * 2 + b.size * 4
                         + n_dst_p * f_out_p * 4)               # output

    out_p = pl.pallas_call(
        sage_kernel,
        out_shape=jax.ShapeDtypeStruct((n_dst_p, f_out_p), jnp.float32),
        grid_spec=pltpu.PrefetchScalarGridSpec(
            num_scalar_prefetch=0,
            grid=grid,
            in_specs=[
                pl.BlockSpec((td, ts), lambda i, k: (i, k)),          # A^T
                pl.BlockSpec((ts, f_in_p), lambda i, k: (k, 0)),      # feat_src
                pl.BlockSpec((td, f_in_p), lambda i, k: (i, 0)),      # feat_dst
                pl.BlockSpec((f_in_p, f_out_p), lambda i, k: (0, 0)), # W_neigh
                pl.BlockSpec((f_in_p, f_out_p), lambda i, k: (0, 0)), # W_self
                pl.BlockSpec((1, f_out_p), lambda i, k: (0, 0)),      # bias
            ],
            out_specs=pl.BlockSpec((td, f_out_p), lambda i, k: (i, 0)),
            scratch_shapes=[
                pltpu.VMEM((td, f_out_p), jnp.float32),   # dstdata accumulator
                pltpu.VMEM((td, 1), jnp.float32),         # degree accumulator
            ],
        ),
        compiler_params=pltpu.CompilerParams(
            dimension_semantics=("parallel", "arbitrary"),
            vmem_limit_bytes=64 * 1024 * 1024,
        ),
        cost_estimate=pl.CostEstimate(
            flops=flops, transcendentals=int(n_dst_p),
            bytes_accessed=bytes_accessed),
    )(a_t, feat_p, feat_p, wn, ws, b)

    return out_p[:n_dst, :f_out]


def xavier_uniform(key, shape, gain):
    fan_out, fan_in = shape
    bound = gain * math.sqrt(6.0 / (fan_in + fan_out))
    return jax.random.uniform(key, shape, jnp.float32, -bound, bound)


if __name__ == "__main__":
    in_feats, out_feats = 32, 16
    n_src, n_dst = 24, 12

    key = jax.random.PRNGKey(0)
    k_a, k_feat, k_wn, k_ws, k_b = jax.random.split(key, 5)

    # Dense 0/1 adjacency (N_src, N_dst); guarantee every dst has >=1 neighbor
    # (the kernel itself also guards zero-degree nodes).
    A = jax.random.bernoulli(k_a, 0.3, (n_src, n_dst)).astype(jnp.float32)
    A = A.at[0, :].set(1.0)

    feat = jax.random.normal(k_feat, (n_src, in_feats), jnp.float32)

    gain = math.sqrt(2.0)  # nn.init.calculate_gain('relu')
    w_neigh = xavier_uniform(k_wn, (out_feats, in_feats), gain)
    w_self = xavier_uniform(k_ws, (out_feats, in_feats), gain)
    b_bound = 1.0 / math.sqrt(in_feats)
    b_self = jax.random.uniform(k_b, (out_feats,), jnp.float32,
                                -b_bound, b_bound)

    out = sage_conv(A, feat, w_neigh, w_self, b_self)
    out = jax.block_until_ready(out)

    # Pure-JAX reference, using the same bf16-quantized operands the kernel
    # feeds the MXU (accumulation in f32), so tolerances stay tight.
    a_bf = A.astype(jnp.bfloat16).astype(jnp.float32)
    feat_bf = feat.astype(jnp.bfloat16).astype(jnp.float32)
    wn_bf = w_neigh.astype(jnp.bfloat16).astype(jnp.float32)
    ws_bf = w_self.astype(jnp.bfloat16).astype(jnp.float32)

    srcdata = feat_bf @ wn_bf.T
    deg = a_bf.sum(0)
    dstdata = (a_bf.T @ srcdata) / jnp.where(deg > 0, deg, 1.0)[:, None]
    ref = feat_bf[:n_dst] @ ws_bf.T + b_self + dstdata

    assert out.shape == (n_dst, out_feats)
    assert bool(jnp.all(jnp.isfinite(out))), "non-finite output"
    assert jnp.allclose(out, ref, atol=5e-2, rtol=5e-2), "mismatch vs reference"

    print("KERNEL_OK")
</pallas_src>

<mosaic_0001>
module attributes {stable_mosaic.version = 11 : i64} {
  func.func @sage_kernel(%arg0: i32, %arg1: i32, %arg2: memref<16x128xbf16, #tpu.memory_space<vmem>>, %arg3: memref<128x128xbf16, #tpu.memory_space<vmem>>, %arg4: memref<16x128xbf16, #tpu.memory_space<vmem>>, %arg5: memref<128x128xbf16, #tpu.memory_space<vmem>>, %arg6: memref<128x128xbf16, #tpu.memory_space<vmem>>, %arg7: memref<1x128xf32, #tpu.memory_space<vmem>>, %arg8: memref<16x128xf32, #tpu.memory_space<vmem>>, %arg9: memref<16x128xf32, #tpu.memory_space<vmem>>, %arg10: memref<16x1xf32, #tpu.memory_space<vmem>>) attributes {dimension_semantics = [#tpu.dimension_semantics<parallel>, #tpu.dimension_semantics<arbitrary>], iteration_bounds = array<i64: 1, 1>, scalar_prefetch = 0 : i64, scratch_operands = 2 : i64, tpu.core_type = #tpu.core_type<tc>, window_params = [{transform_indices = @transform_0, window_bounds = array<i64: 16, 128>}, {transform_indices = @transform_1, window_bounds = array<i64: 128, 128>}, {transform_indices = @transform_2, window_bounds = array<i64: 16, 128>}, {pipeline_mode = #tpu.pipeline_mode<synchronous>, transform_indices = @transform_3, window_bounds = array<i64: 128, 128>}, {pipeline_mode = #tpu.pipeline_mode<synchronous>, transform_indices = @transform_4, window_bounds = array<i64: 128, 128>}, {pipeline_mode = #tpu.pipeline_mode<synchronous>, transform_indices = @transform_5, window_bounds = array<i64: 1, 128>}, {transform_indices = @transform_6, window_bounds = array<i64: 16, 128>}]} {
    %c0_i32 = arith.constant 0 : i32
    %0 = arith.cmpi eq, %arg1, %c0_i32 : i32
    %1 = arith.extui %0 : i1 to i32
    %c0_i32_0 = arith.constant 0 : i32
    %2 = arith.cmpi ne, %1, %c0_i32_0 : i32
    scf.if %2 {
      %cst_18 = arith.constant 0.000000e+00 : f32
      %21 = vector.broadcast %cst_18 : f32 to vector<16x128xf32>
      %c0_19 = arith.constant 0 : index
      %c0_20 = arith.constant 0 : index
      %22 = vector.load %arg9[%c0_19, %c0_20] : memref<16x128xf32, #tpu.memory_space<vmem>>, vector<16x128xf32>
      tpu.vector_store %arg9[%c0_19, %c0_20], %21 {strides = array<i32>} : memref<16x128xf32, #tpu.memory_space<vmem>>, vector<16x128xf32>,
      %cst_21 = arith.constant 0.000000e+00 : f32
      %23 = vector.broadcast %cst_21 : f32 to vector<16x1xf32>
      %c0_22 = arith.constant 0 : index
      %c0_23 = arith.constant 0 : index
      %24 = vector.load %arg10[%c0_22, %c0_23] : memref<16x1xf32, #tpu.memory_space<vmem>>, vector<16x1xf32>
      tpu.vector_store %arg10[%c0_22, %c0_23], %23 {strides = array<i32>} : memref<16x1xf32, #tpu.memory_space<vmem>>, vector<16x1xf32>,
    } else {
    }
    %c0 = arith.constant 0 : index
    %c0_1 = arith.constant 0 : index
    %3 = vector.load %arg2[%c0, %c0_1] : memref<16x128xbf16, #tpu.memory_space<vmem>>, vector<16x128xbf16>
    %c0_2 = arith.constant 0 : index
    %c0_3 = arith.constant 0 : index
    %4 = vector.load %arg10[%c0_2, %c0_3] : memref<16x1xf32, #tpu.memory_space<vmem>>, vector<16x1xf32>
    %5 = arith.extf %3 : vector<16x128xbf16> to vector<16x128xf32>
    %cst = arith.constant dense<0.000000e+00> : vector<16xf32>
    %6 = vector.multi_reduction <add>, %5, %cst [1] : vector<16x128xf32> to vector<16xf32>
    %7 = vector.shape_cast %6 : vector<16xf32> to vector<16x1xf32>
    %8 = arith.addf %4, %7 : vector<16x1xf32>
    %c0_4 = arith.constant 0 : index
    %c0_5 = arith.constant 0 : index
    %9 = vector.load %arg10[%c0_4, %c0_5] : memref<16x1xf32, #tpu.memory_space<vmem>>, vector<16x1xf32>
    tpu.vector_store %arg10[%c0_4, %c0_5], %8 {strides = array<i32>} : memref<16x1xf32, #tpu.memory_space<vmem>>, vector<16x1xf32>,
    %c0_6 = arith.constant 0 : index
    %c0_7 = arith.constant 0 : index
    %10 = vector.load %arg3[%c0_6, %c0_7] : memref<128x128xbf16, #tpu.memory_space<vmem>>, vector<128x128xbf16>
    %c0_8 = arith.constant 0 : index
    %c0_9 = arith.constant 0 : index
    %11 = vector.load %arg5[%c0_8, %c0_9] : memref<128x128xbf16, #tpu.memory_space<vmem>>, vector<128x128xbf16>
    %cst_10 = arith.constant dense<0.000000e+00> : vector<128x128xf32>
    %12 = tpu.matmul %10, %11, %cst_10 {dimension_numbers = #tpu.dot_dimension_numbers<[1], [0], [0], [1], [0, 0, 1, 1], [], []>} : vector<128x128xbf16>, vector<128x128xbf16>, vector<128x128xf32> -> vector<128x128xf32>
    %c0_11 = arith.constant 0 : index
    %c0_12 = arith.constant 0 : index
    %13 = vector.load %arg9[%c0_11, %c0_12] : memref<16x128xf32, #tpu.memory_space<vmem>>, vector<16x128xf32>
    %14 = arith.truncf %12 : vector<128x128xf32> to vector<128x128xbf16>
    %cst_13 = arith.constant dense<0.000000e+00> : vector<16x128xf32>
    %15 = tpu.matmul %3, %14, %cst_13 {dimension_numbers = #tpu.dot_dimension_numbers<[1], [0], [0], [1], [0, 0, 1, 1], [], []>} : vector<16x128xbf16>, vector<128x128xbf16>, vector<16x128xf32> -> vector<16x128xf32>
    %16 = arith.addf %13, %15 : vector<16x128xf32>
    %c0_14 = arith.constant 0 : index
    %c0_15 = arith.constant 0 : index
    %17 = vector.load %arg9[%c0_14, %c0_15] : memref<16x128xf32, #tpu.memory_space<vmem>>, vector<16x128xf32>
    tpu.vector_store %arg9[%c0_14, %c0_15], %16 {strides = array<i32>} : memref<16x128xf32, #tpu.memory_space<vmem>>, vector<16x128xf32>,
    %c0_i32_16 = arith.constant 0 : i32
    %18 = arith.cmpi eq, %arg1, %c0_i32_16 : i32
    %19 = arith.extui %18 : i1 to i32
    %c0_i32_17 = arith.constant 0 : i32
    %20 = arith.cmpi ne, %19, %c0_i32_17 : i32
    scf.if %20 {
      %c0_18 = arith.constant 0 : index
      %c0_19 = arith.constant 0 : index
      %21 = vector.load %arg10[%c0_18, %c0_19] : memref<16x1xf32, #tpu.memory_space<vmem>>, vector<16x1xf32>
      %cst_20 = arith.constant 0.000000e+00 : f32
      %22 = vector.broadcast %cst_20 : f32 to vector<16x1xf32>
      %23 = arith.cmpf ogt, %21, %22 : vector<16x1xf32>
      %24 = tpu.reciprocal %21 {approx = true} : vector<16x1xf32> -> vector<16x1xf32>
      %cst_21 = arith.constant 0.000000e+00 : f32
      %25 = vector.broadcast %cst_21 : f32 to vector<16x1xf32>
      %26 = arith.select %23, %24, %25 : vector<16x1xi1>, vector<16x1xf32>
      %c0_22 = arith.constant 0 : index
      %c0_23 = arith.constant 0 : index
      %27 = vector.load %arg9[%c0_22, %c0_23] : memref<16x128xf32, #tpu.memory_space<vmem>>, vector<16x128xf32>
      %28 = vector.broadcast %26 : vector<16x1xf32> to vector<16x128xf32>
      %29 = arith.mulf %27, %28 : vector<16x128xf32>
      %c0_24 = arith.constant 0 : index
      %c0_25 = arith.constant 0 : index
      %30 = vector.load %arg4[%c0_24, %c0_25] : memref<16x128xbf16, #tpu.memory_space<vmem>>, vector<16x128xbf16>
      %c0_26 = arith.constant 0 : index
      %c0_27 = arith.constant 0 : index
      %31 = vector.load %arg6[%c0_26, %c0_27] : memref<128x128xbf16, #tpu.memory_space<vmem>>, vector<128x128xbf16>
      %cst_28 = arith.constant dense<0.000000e+00> : vector<16x128xf32>
      %32 = tpu.matmul %30, %31, %cst_28 {dimension_numbers = #tpu.dot_dimension_numbers<[1], [0], [0], [1], [0, 0, 1, 1], [], []>} : vector<16x128xbf16>, vector<128x128xbf16>, vector<16x128xf32> -> vector<16x128xf32>
      %c0_29 = arith.constant 0 : index
      %c0_30 = arith.constant 0 : index
      %33 = vector.load %arg7[%c0_29, %c0_30] : memref<1x128xf32, #tpu.memory_space<vmem>>, vector<1x128xf32>
      %34 = vector.broadcast %33 : vector<1x128xf32> to vector<16x128xf32>
      %35 = arith.addf %32, %34 : vector<16x128xf32>
      %36 = arith.addf %35, %29 : vector<16x128xf32>
      %c0_31 = arith.constant 0 : index
      %c0_32 = arith.constant 0 : index
      %37 = vector.load %arg8[%c0_31, %c0_32] : memref<16x128xf32, #tpu.memory_space<vmem>>, vector<16x128xf32>
      tpu.vector_store %arg8[%c0_31, %c0_32], %36 {strides = array<i32>} : memref<16x128xf32, #tpu.memory_space<vmem>>, vector<16x128xf32>,
    } else {
    }
    return
  }
  func.func @transform_0(%arg0: i32, %arg1: i32) -> (i32, i32) {
    %c0_i32 = arith.constant 0 : i32
    return %arg0, %arg1 : i32, i32
  }
  func.func @transform_1(%arg0: i32, %arg1: i32) -> (i32, i32) {
    %c0_i32 = arith.constant 0 : i32
    %c0_i32_0 = arith.constant 0 : i32
    return %arg1, %c0_i32 : i32, i32
  }
  func.func @transform_2(%arg0: i32, %arg1: i32) -> (i32, i32) {
    %c0_i32 = arith.constant 0 : i32
    %c0_i32_0 = arith.constant 0 : i32
    return %arg0, %c0_i32 : i32, i32
  }
  func.func @transform_3(%arg0: i32, %arg1: i32) -> (i32, i32) {
    %c0_i32 = arith.constant 0 : i32
    %c0_i32_0 = arith.constant 0 : i32
    %c0_i32_1 = arith.constant 0 : i32
    return %c0_i32, %c0_i32_0 : i32, i32
  }
  func.func @transform_4(%arg0: i32, %arg1: i32) -> (i32, i32) {
    %c0_i32 = arith.constant 0 : i32
    %c0_i32_0 = arith.constant 0 : i32
    %c0_i32_1 = arith.constant 0 : i32
    return %c0_i32, %c0_i32_0 : i32, i32
  }
  func.func @transform_5(%arg0: i32, %arg1: i32) -> (i32, i32) {
    %c0_i32 = arith.constant 0 : i32
    %c0_i32_0 = arith.constant 0 : i32
    %c0_i32_1 = arith.constant 0 : i32
    return %c0_i32, %c0_i32_0 : i32, i32
  }
  func.func @transform_6(%arg0: i32, %arg1: i32) -> (i32, i32) {
    %c0_i32 = arith.constant 0 : i32
    %c0_i32_0 = arith.constant 0 : i32
    return %arg0, %c0_i32 : i32, i32
  }
}

</mosaic_0001>

<bundles_post_ra>
// kernel: tpu_custom_call.1
= control target key start
LH: loop header
LB: loop body
LE: loop exit
PB: predicated region body
PF: predicated region fallthrough
CT: control target
= control target key end

     0   :  { %11 = vsyncpa [#allocation5], 0  ;;  %s987_s0 = inlined_call_operand.hbm [shape: bf16[16,128], index: 0, kind: input, shape index: {}]   ;;  %s988_s1 = inlined_call_operand.hbm [shape: bf16[128,128], index: 1, kind: input, shape index: {}]   ;;  %s989_s2 = inlined_call_operand.hbm [shape: bf16[128,128], index: 2, kind: input, shape index: {}]   ;;  %s990_s3 = inlined_call_operand.hbm [shape: bf16[128,128], index: 3, kind: input, shape index: {}]   ;;  %s991_s4 = inlined_call_operand.hbm [shape: bf16[128,128], index: 4, kind: input, shape index: {}]   ;;  %s992_s5 = inlined_call_operand.vmem [shape: f32[1,128], index: 5, kind: input, shape index: {}]   ;;  %s993_s6 = inlined_call_operand.hbm [shape: f32[16,128], index: 6, kind: output, shape index: {}]  }
   0x1   :  { %12 = vsyncpa [#allocation8], 0 }
   0x2   :  { %13 = vsyncpa [#allocation11], 0 }
   0x3   :  { %14 = vsyncpa [#allocation6], 0  ;;  %s878_s21 = smov [#allocation7]   ;;  %s879_s23 = smov [#allocation10]  }
   0x4   :  { %s32_s22 = sshll.u32 %s878_s21, 4  ;;  %s56_s24 = sshll.u32 %s879_s23, 4  ;;  %s33_s22 = int_to_ptr.vmem [resolvable:$true] %s32_s22  ;;  %s57_s24 = int_to_ptr.vmem [resolvable:$true] %s56_s24 }
   0x5   :  { %s758_s25 = scalar_lea.vmem %s33_s22, 1024  ;;  %p763_p1 = scmp.lt.s32.totalorder %s33_s22, %s33_s22 }
   0x6   :  { %p759_p0 = scmp.ne.s32.totalorder %s33_s22, %s758_s25  ;;  %p764_p2 = scmp.lt.s32.totalorder %s758_s25, %s758_s25 }
   0x8   :  { %p765_p3 = por %p764_p2, %p763_p1 }
   0xa   :  { %p766_p4 = pnand %p765_p3, %p759_p0 }
   0xc   :  { %769 = shalt.err (!%p766_p4)
}
   0xd   :  { %s880_s26 = smov 64   ;;  %s881_s27 = smov 4  }
   0xe   :  { %38 = dma.hbm_to_vmem [thread:$0]  %s988_s1, 1024, %s33_s22, [#allocation8], %s880_s26, %s880_s26, %s881_s27  }
   0xf   :  { %s778_s30 = scalar_lea.vmem %s57_s24, 1024  ;;  %p783_p6 = scmp.lt.s32.totalorder %s57_s24, %s57_s24 }
  0x10   :  { %p779_p5 = scmp.ne.s32.totalorder %s57_s24, %s778_s30  ;;  %p784_p7 = scmp.lt.s32.totalorder %s778_s30, %s778_s30 }
  0x12   :  { %p785_p8 = por %p784_p7, %p783_p6 }
  0x14   :  { %p786_p9 = pnand %p785_p8, %p779_p5 }
  0x16   :  { %789 = shalt.err (!%p786_p9)
}
  0x17   :  { %62 = dma.hbm_to_vmem [thread:$0]  %s990_s3, 1024, %s57_s24, [#allocation11], %s880_s26, %s880_s26, %s881_s27  }
  0x18   :  { %s882_s9 = smov [#allocation4]   ;;  %s883_s11 = smov [#allocation9]  }
  0x19   :  { %s20_s10 = sshll.u32 %s882_s9, 4  ;;  %s44_s12 = sshll.u32 %s883_s11, 4  ;;  %s21_s10 = int_to_ptr.vmem [resolvable:$true] %s20_s10  ;;  %s45_s12 = int_to_ptr.vmem [resolvable:$true] %s44_s12 }
  0x1a   :  { %s798_s1 = scalar_lea.vmem %s21_s10, 128  ;;  %p803_p11 = scmp.lt.s32.totalorder %s21_s10, %s21_s10 }
  0x1b   :  { %p799_p10 = scmp.ne.s32.totalorder %s21_s10, %s798_s1  ;;  %p804_p12 = scmp.lt.s32.totalorder %s798_s1, %s798_s1 }
  0x1d   :  { %p805_p13 = por %p804_p12, %p803_p11 }
  0x1f   :  { %p806_p0 = pnand %p805_p13, %p799_p10 }
  0x21   :  { %809 = shalt.err (!%p806_p0)
}
  0x22   :  { %26 = dma.hbm_to_vmem [thread:$0]  %s987_s0, 128, %s21_s10, [#allocation5], %s880_s26, %s880_s26, %s881_s27  }
  0x23   :  { %s818_s3 = scalar_lea.vmem %s45_s12, 128  ;;  %p823_p2 = scmp.lt.s32.totalorder %s45_s12, %s45_s12 }
  0x24   :  { %p819_p1 = scmp.ne.s32.totalorder %s45_s12, %s818_s3  ;;  %p824_p3 = scmp.lt.s32.totalorder %s818_s3, %s818_s3 }
  0x26   :  { %p825_p4 = por %p824_p3, %p823_p2 }
  0x28   :  { %p826_p5 = pnand %p825_p4, %p819_p1 }
  0x2a   :  { %829 = shalt.err (!%p826_p5)
}
  0x2b   :  { %50 = dma.hbm_to_vmem [thread:$0]  %s989_s2, 128, %s45_s12, [#allocation8], %s880_s26, %s880_s26, %s881_s27  }
  0x2c   :  { %s884_s17 = smov [#allocation12]  }
  0x2d   :  { %s68_s18 = sshll.u32 %s884_s17, 4  ;;  %s69_s18 = int_to_ptr.vmem [resolvable:$true] %s68_s18 }
  0x2e   :  { %s838_s19 = scalar_lea.vmem %s69_s18, 1024  ;;  %p843_p7 = scmp.lt.s32.totalorder %s69_s18, %s69_s18 }
  0x2f   :  { %p839_p6 = scmp.ne.s32.totalorder %s69_s18, %s838_s19  ;;  %p844_p8 = scmp.lt.s32.totalorder %s838_s19, %s838_s19 }
  0x31   :  { %p845_p9 = por %p844_p8, %p843_p7 }
  0x33   :  { %p846_p10 = pnand %p845_p9, %p839_p6 }
  0x35   :  { %849 = shalt.err (!%p846_p10)
}
  0x36   :  { %74 = dma.hbm_to_vmem [thread:$0]  %s991_s4, 1024, %s69_s18, [#allocation11], %s880_s26, %s880_s26, %s881_s27  }
  0x37   :  { %870 = dma.done.wait [#allocation5], 128  }
  0x38   :  { %871 = vsyncadd [#allocation5], 4294967168 }
  0x39   :  { %872 = dma.done.wait [#allocation8], 1152  }
  0x3a   :  { %873 = vsyncadd [#allocation8], 4294966144 }
  0x3b   :  { %874 = dma.done.wait [#allocation11], 2048  }
  0x3c   :  { %875 = vsyncadd [#allocation11], 4294965248  ;;  %v719_v0 = vld [vmem:[#allocation10 + $0x38] sm:$0xff]   ;;  %v720_v1 = vld [vmem:[#allocation10 + $0x30] sm:$0xff]   ;;  %v885_v20 = vmov 0.0   ;;  %vm886_vm0 = vmmov 0  }
  0x3d   :  { %632 = vmatprep.subr.bf16.mxu0 %v719_v0  ;;  %v721_v2 = vld [vmem:[#allocation10 + $0x28] sm:$0xff]   ;;  %v722_v3 = vld [vmem:[#allocation10 + $0x20] sm:$0xff]   ;;  %v727_v4 = vld [vmem:[#allocation7] sm:$0xff]   ;;  %664 = vmatprep.subr.bf16.mxu1 %v885_v20  ;;  %vm99_vm1 = vcmask 7168   ;;  %v887_v30 = vmov 0   ;;  %s888_s21 = smov [#allocation13]  }
  0x3e   :  { %633 = vmatpush3.bf16.msra.mxu0 %v719_v0  ;;  %648 = vmatprep.mubr.bf16.mxu0 %v727_v4  ;;  %v723_v5 = vld [vmem:[#allocation10 + $0x18] sm:$0xff]   ;;  %v724_v6 = vld [vmem:[#allocation10 + $0x10] sm:$0xff]   ;;  %v725_v9 = vld [vmem:[#allocation10 + $0x8] sm:$0xff]   ;;  %100 = vst.msk [vmem:[#allocation3] sm:$0xff] %vm99_vm1, %v885_v20  ;;  %s557_s22 = sshll.u32 %s888_s21, 4  ;;  %s558_s22 = int_to_ptr.vmem [resolvable:$true] %s557_s22 }
  0x3f   :  { %634 = vmatprep.subr.bf16.mxu0 %v720_v1  ;;  %v956_v7 = vld [vmem:[#allocation4] sm:$0xff]   ;;  %v726_v11 = vld [vmem:[#allocation10] sm:$0xff]   ;;  %v729_v13 = vld [vmem:[#allocation7 + $0x10] sm:$0xff]   ;;  %680 = vmatprep.mubr.msk.bf16.mxu1 %vm886_vm0, %v885_v20  ;;  %101 = vst.msk [vmem:[#allocation3 + $0x8] sm:$0xff] %vm99_vm1, %v885_v20  ;;  %s850_s23 = scalar_lea.vmem %s558_s22, 256  ;;  %p855_p12 = scmp.lt.s32.totalorder %s558_s22, %s558_s22 }
  0x40   :  { %v106_v8 = vunpack.c.l.bf16 %v956_v7  ;;  %v107_v10 = vunpack.c.h.bf16 %v956_v7  ;;  %v728_v12 = vld [vmem:[#allocation7 + $0x8] sm:$0xff]   ;;  %v730_v14 = vld [vmem:[#allocation7 + $0x18] sm:$0xff]   ;;  %v731_v15 = vld [vmem:[#allocation7 + $0x20] sm:$0xff]   ;;  %717 = vset.pattern.permute.xlu1 %v887_v30  ;;  %718 = vset.pattern.permute.xlu0 %v887_v30  ;;  %p851_p11 = scmp.ne.s32.totalorder %s558_s22, %s850_s23  ;;  %p856_p13 = scmp.lt.s32.totalorder %s850_s23, %s850_s23 }
  0x41   :  { %v732_v16 = vld [vmem:[#allocation7 + $0x28] sm:$0xff]   ;;  %v733_v17 = vld [vmem:[#allocation7 + $0x30] sm:$0xff]   ;;  %v734_v18 = vld [vmem:[#allocation7 + $0x38] sm:$0xff]  }
  0x42   :  { %635 = vmatpush3.bf16.msra.mxu0 %v720_v1  ;;  %108 = vadd.xlane.f32.xlu0 %v106_v8  ;;  %v736_v19 = vld [vmem:[#allocation12 + $0x38] sm:$0xff]   ;;  %v737_v21 = vld [vmem:[#allocation12 + $0x30] sm:$0xff]   ;;  %v738_v22 = vld [vmem:[#allocation12 + $0x28] sm:$0xff]   ;;  %p857_p0 = por %p856_p13, %p855_p12 }
  0x43   :  { %636 = vmatprep.subr.bf16.mxu0 %v721_v2  ;;  %v739_v23 = vld [vmem:[#allocation12 + $0x20] sm:$0xff]   ;;  %v740_v24 = vld [vmem:[#allocation12 + $0x18] sm:$0xff]   ;;  %v741_v25 = vld [vmem:[#allocation12 + $0x10] sm:$0xff]  }
  0x44   :  { %v742_v26 = vld [vmem:[#allocation12 + $0x8] sm:$0xff]   ;;  %v743_v27 = vld [vmem:[#allocation12] sm:$0xff]   ;;  %v744_v28 = vld [vmem:[#allocation9] sm:$0xff]   ;;  %p858_p1 = pnand %p857_p0, %p851_p11 }
  0x45   :  { %v104_v32 = vld [vmem:[#allocation3] sm:$0xff] }
  0x46   :  { %637 = vmatpush3.bf16.msra.mxu0 %v721_v2  ;;  %110 = vadd.xlane.f32.xlu0 %v107_v10  ;;  %v105_v33 = vld [vmem:[#allocation3 + $0x8] sm:$0xff] }
  0x47   :  { %638 = vmatprep.subr.bf16.mxu0 %v722_v3 }
  0x4a   :  { %639 = vmatpush3.bf16.msra.mxu0 %v722_v3 }
  0x4b   :  { %640 = vmatprep.subr.bf16.mxu0 %v723_v5 }
  0x4e   :  { %641 = vmatpush3.bf16.msra.mxu0 %v723_v5 }
  0x4f   :  { %642 = vmatprep.subr.bf16.mxu0 %v724_v6 }
  0x52   :  { %643 = vmatpush3.bf16.msra.mxu0 %v724_v6  ;;  %v588_v6 = vld [vmem:[%s992_s5] ss:$0 sm:$0xff] }
  0x53   :  { %644 = vmatprep.subr.bf16.mxu0 %v725_v9 }
  0x56   :  { %645 = vmatpush3.bf16.msra.mxu0 %v725_v9 }
  0x57   :  { %646 = vmatprep.subr.bf16.mxu0 %v726_v11 }
  0x5a   :  { %647 = vmatpush3.bf16.msra.mxu0 %v726_v11 }
  0x5b   :  { %684 = vmatprep.subr.bf16.mxu0 %v885_v20 }
  0x5d   :  { %649 = vmatmul.mubr.bf16.vlgmr.msra.gmra.mxu0 %v728_v12 }
  0x5e   :  { %652 = vmatprep.mubr.bf16.mxu0 %v729_v13  ;;  %685 = vmatpush3.bf16.msra.mxu0 %v736_v19 }
  0x5f   :  { %686 = vmatprep.subr.bf16.mxu0 %v885_v20 }
  0x62   :  { %687 = vmatpush3.bf16.msra.mxu0 %v737_v21 }
  0x63   :  { %688 = vmatprep.subr.bf16.mxu0 %v885_v20 }
  0x65   :  { %653 = vmatmul.mubr.bf16.gmra.mxu0 %v730_v14 }
  0x66   :  { %656 = vmatprep.mubr.bf16.mxu0 %v731_v15  ;;  %689 = vmatpush3.bf16.msra.mxu0 %v738_v22 }
  0x67   :  { %690 = vmatprep.subr.bf16.mxu0 %v885_v20 }
  0x6a   :  { %691 = vmatpush3.bf16.msra.mxu0 %v739_v23 }
  0x6b   :  { %692 = vmatprep.subr.bf16.mxu0 %v885_v20 }
  0x6d   :  { %657 = vmatmul.mubr.bf16.gmra.mxu0 %v732_v16 }
  0x6e   :  { %660 = vmatprep.mubr.bf16.mxu0 %v733_v17  ;;  %693 = vmatpush3.bf16.msra.mxu0 %v740_v24 }
  0x6f   :  { %694 = vmatprep.subr.bf16.mxu0 %v885_v20 }
  0x72   :  { %695 = vmatpush3.bf16.msra.mxu0 %v741_v25 }
  0x73   :  { %696 = vmatprep.subr.bf16.mxu0 %v885_v20 }
  0x75   :  { %661 = vmatmul.mubr.bf16.gmra.mxu0 %v734_v18 }
  0x76   :  { %697 = vmatpush3.bf16.msra.mxu0 %v742_v26  ;;  %700 = vmatprep.mubr.msk.bf16.mxu0 %vm886_vm0, %v885_v20 }
  0x77   :  { %698 = vmatprep.subr.bf16.mxu0 %v885_v20 }
  0x7a   :  { %699 = vmatpush3.bf16.msra.mxu0 %v743_v27 }
  0x7d   :  { %701 = vmatmul.mubr.bf16.vlgmr.msra.gmra.mxu0 %v744_v28 }
  0xcb   :  { %v109_v29 = vpop.xlane.xlu0 %108 }
  0xcc   :  { %v112_v34 = vadd.f32 %v109_v29, %v104_v32 }
  0xce   :  { %115 = vst.msk [vmem:[#allocation3] sm:$0xff] %vm99_vm1, %v112_v34 }
  0xcf   :  { %v111_v31 = vpop.xlane.xlu0 %110 }
  0xd0   :  { %v113_v35 = vadd.f32 %v111_v31, %v105_v33 }
  0xd2   :  { %116 = vst.msk [vmem:[#allocation3 + $0x8] sm:$0xff] %vm99_vm1, %v113_v35 }
  0xd5   :  { %v406_v36 = vld [vmem:[#allocation3] sm:$0xff] }
  0xd6   :  { %746 = vrcp.f32 %v406_v36  ;;  %vm408_vm2 = vcmp.gt.f32.partialorder %v406_v36, 0.0 }
  0xd9   :  { %v407_v37 = vld [vmem:[#allocation3 + $0x8] sm:$0xff] }
  0xda   :  { %748 = vrcp.f32 %v407_v37  ;;  %vm409_vm3 = vcmp.gt.f32.partialorder %v407_v37, 0.0 }
  0xe3   :  { %v747_v38 = vpop.eup %746 }
  0xe4   :  { %v412_v40 = vsel %vm408_vm2, %v747_v38, 0.0 }
  0xe5   :  { %418 = vperm.xlu1 %717, %v412_v40  }
  0xe7   :  { %v749_v39 = vpop.eup %748 }
  0xe8   :  { %v413_v41 = vsel %vm409_vm3, %v749_v39, 0.0 }
  0xe9   :  { %423 = vperm.xlu1 %717, %v413_v41  }
 0x11d   :  { %v650_v42 = vpop.f32.mrf.mxu0 }
 0x11f   :  { %v279_v43 = vpop.f32.mrf.mxu0 }
 0x121   :  { %v651_v44 = vpop.f32.mrf.mxu0 }
 0x122   :  { %v345_v0 = vpack.c.bf16 %v651_v44, %v650_v42 }
 0x123   :  { %v282_v45 = vpop.f32.mrf.mxu0 }
 0x124   :  { %v344_v1 = vpack.c.bf16 %v282_v45, %v279_v43 }
 0x125   :  { %v654_v46 = vpop.f32.mrf.mxu0 }
 0x127   :  { %v295_v47 = vpop.f32.mrf.mxu0 }
 0x129   :  { %v655_v48 = vpop.f32.mrf.mxu0 }
 0x12a   :  { %v347_v62 = vpack.c.bf16 %v655_v48, %v654_v46 }
 0x12b   :  { %v298_v49 = vpop.f32.mrf.mxu0 }
 0x12c   :  { %v346_v63 = vpack.c.bf16 %v298_v49, %v295_v47 }
 0x12d   :  { %v658_v50 = vpop.f32.mrf.mxu0 }
 0x12f   :  { %v311_v51 = vpop.f32.mrf.mxu0 }
 0x131   :  { %v659_v52 = vpop.f32.mrf.mxu0 }
 0x132   :  { %v349_v60 = vpack.c.bf16 %v659_v52, %v658_v50 }
 0x133   :  { %v314_v53 = vpop.f32.mrf.mxu0 }
 0x134   :  { %v348_v61 = vpack.c.bf16 %v314_v53, %v311_v51 }
 0x135   :  { %v662_v54 = vpop.f32.mrf.mxu0 }
 0x137   :  { %v327_v55 = vpop.f32.mrf.mxu0 }
 0x139   :  { %v663_v56 = vpop.f32.mrf.mxu0 }
 0x13a   :  { %v351_v57 = vpack.c.bf16 %v663_v56, %v662_v54 }
 0x13b   :  { %v330_v58 = vpop.f32.mrf.mxu0 }
 0x13c   :  { %665 = vmatpush3.bf16.msra.mxu1 %v351_v57  ;;  %v350_v59 = vpack.c.bf16 %v330_v58, %v327_v55 }
 0x13d   :  { %666 = vmatprep.subr.bf16.mxu1 %v885_v20  ;;  %v541_v2 = vpop.f32.mrf.mxu0 }
 0x13e   :  { %v542_v9 = vadd.f32 %v588_v6, %v541_v2 }
 0x13f   :  { %v702_v3 = vpop.f32.mrf.mxu0 }
 0x140   :  { %667 = vmatpush3.bf16.msra.mxu1 %v350_v59 }
 0x141   :  { %668 = vmatprep.subr.bf16.mxu1 %v885_v20  ;;  %v544_v4 = vpop.f32.mrf.mxu0 }
 0x142   :  { %v545_v16 = vadd.f32 %v588_v6, %v544_v4 }
 0x143   :  { %v703_v5 = vpop.f32.mrf.mxu0 }
 0x144   :  { %669 = vmatpush3.bf16.msra.mxu1 %v349_v60 }
 0x145   :  { %670 = vmatprep.subr.bf16.mxu1 %v885_v20 }
 0x148   :  { %671 = vmatpush3.bf16.msra.mxu1 %v348_v61 }
 0x149   :  { %672 = vmatprep.subr.bf16.mxu1 %v885_v20 }
 0x14c   :  { %673 = vmatpush3.bf16.msra.mxu1 %v347_v62 }
 0x14d   :  { %674 = vmatprep.subr.bf16.mxu1 %v885_v20 }
 0x150   :  { %675 = vmatpush3.bf16.msra.mxu1 %v346_v63 }
 0x151   :  { %676 = vmatprep.subr.bf16.mxu1 %v885_v20 }
 0x154   :  { %677 = vmatpush3.bf16.msra.mxu1 %v345_v0 }
 0x155   :  { %678 = vmatprep.subr.bf16.mxu1 %v885_v20 }
 0x158   :  { %679 = vmatpush3.bf16.msra.mxu1 %v344_v1 }
 0x15b   :  { %681 = vmatmul.mubr.bf16.vlgmr.msra.gmra.mxu1 %v956_v7 }
 0x160   :  { %v419_v8 = vpop.permute.xlu1 %418 }
 0x164   :  { %v424_v14 = vpop.permute.xlu1 %423 }
 0x21b   :  { %v392_v10 = vpop.f32.mrf.mxu1 }
 0x21c   :  { %v426_v11 = vmul.f32 %v419_v8, %v392_v10 }
 0x21d   :  { %v682_v12 = vpop.f32.mrf.mxu1 }
 0x21e   :  { %v548_v13 = vadd.f32 %v542_v9, %v426_v11 }
 0x21f   :  { %v395_v15 = vpop.f32.mrf.mxu1 }
 0x220   :  { %550 = vst [vmem:[#allocation13] sm:$0xff] %v548_v13  ;;  %v427_v7 = vmul.f32 %v424_v14, %v395_v15 }
 0x221   :  { %v683_v17 = vpop.f32.mrf.mxu1 }
 0x222   :  { %v549_v18 = vadd.f32 %v545_v16, %v427_v7 }
 0x224   :  { %551 = vst [vmem:[#allocation13 + $0x8] sm:$0xff] %v549_v18 }
 0x225   :  { %861 = shalt.err (!%p858_p1)
}
 0x226   :  { %s889_s5 = smov 128   ;;  %s890_s24 = smov 8  }
 0x227   :  { %563 = dma.vmem_to_hbm [thread:$0]  %s558_s22, 256, %s993_s6, [#allocation6], %s889_s5, %s889_s5, %s890_s24  }
 0x228   :  { %876 = dma.done.wait [#allocation6], 256  }
 0x229   :  { %877 = vsyncadd [#allocation6], 4294967040 }
 0x22a   :  { %567 = vsyncpa [#allocation5], 1 }
 0x22b   :  { %568 = vsyncpa [#allocation8], 1 }
 0x22c   :  { %569 = vsyncpa [#allocation11], 1 }
 0x22d   :  { %570 = vsyncpa [#allocation6], 1 }

</bundles_post_ra>
